<compile_context>
chip_gen: v5e
topology: v5e:2x2
jax: 0.10.0
libtpu: 0.0.40
codegen_flags: <defaults>
</compile_context>

<pallas_src>
import math

import jax
import jax.numpy as jnp
from jax.experimental import pallas as pl
from jax.experimental.pallas import tpu as pltpu


def _make_moe_kernel(acc_in_output: bool):
    """Kernel factory. acc_in_output=True -> accumulate directly in o_ref (f32 out)."""

    def kernel(ew_ref, x_ref, w_ref, b_ref, o_ref, *scratch):
        # ew_ref : SMEM (E,)            f32   expert gating weights
        # x_ref  : VMEM (n_k, B, TI)          full input, resident across grid
        # w_ref  : VMEM (E, TI, TO)           contiguous weight tile, (in, out)
        # b_ref  : VMEM (1, TO)         f32   pre-mixed bias tile
        # o_ref  : VMEM (B, TO)               output tile (resident across k)
        # scratch: optional VMEM (B, TO) f32 accumulator (non-f32 outputs)
        acc_ref = o_ref if acc_in_output else scratch[0]
        k = pl.program_id(1)
        num_k = pl.num_programs(1)
        num_expert = w_ref.shape[0]

        @pl.when(k == 0)
        def _init():
            acc_ref[...] = jnp.zeros_like(acc_ref)

        x = x_ref[k]                              # (B, TI)
        if x.dtype != w_ref.dtype:
            x = x.astype(w_ref.dtype)             # native-MXU dtype (e.g. bf16)

        acc = acc_ref[...]
        # Static unroll over experts: fold the expert mix into per-expert
        # matmuls; no mixed-weight or (E, TI, TO) broadcast temporary.
        for e in range(num_expert):
            acc = acc + ew_ref[e] * jnp.dot(
                x, w_ref[e], preferred_element_type=jnp.float32)
        acc_ref[...] = acc

        @pl.when(k == num_k - 1)
        def _finalize():
            mixed_b = b_ref[...]                  # (1, TO) f32
            if acc_in_output:
                o_ref[...] = o_ref[...] + mixed_b
            else:
                o_ref[...] = (acc_ref[...] + mixed_b).astype(o_ref.dtype)

    return kernel


def _round_up(x, m):
    return ((x + m - 1) // m) * m


def _cdiv(a, b):
    return (a + b - 1) // b


def _vmem_capacity_bytes():
    try:
        info = pltpu.get_tpu_info()
        cap = getattr(info, "vmem_capacity_bytes", None)
        if cap:
            return int(cap)
    except Exception:
        pass
    return 0   # unknown -> treat conservatively


def moe_classifier(x, expert_weights, weight, bias=None, *,
                   weights_dtype=None, block_out=1024, block_in=1024):
    """MOEClassifier forward: F.linear(x, sum_e ew[e]*W[e], sum_e ew[e]*b[e])."""
    B, I = x.shape
    E, O, I2 = weight.shape
    assert I == I2, (I, I2)
    if bias is not None:
        assert bias.shape == (E, O)

    ew = jnp.asarray(expert_weights, dtype=jnp.float32)
    assert ew.shape == (E,)

    w_dtype = jnp.dtype(weights_dtype) if weights_dtype is not None \
        else jnp.dtype(weight.dtype)
    out_dtype = jnp.dtype(x.dtype)
    acc_in_output = out_dtype == jnp.dtype(jnp.float32)

    # ---- generation-aware scoped-VMEM budget ------------------------------
    vmem_cap = _vmem_capacity_bytes()
    if vmem_cap >= (100 << 20):          # v5e / v6e: 128 MiB physical VMEM
        budget = 96 << 20
    else:                                # v7x (64 MiB / TC) or unknown
        budget = 48 << 20

    # ---- tile selection ----------------------------------------------------
    w_isz = w_dtype.itemsize
    x_isz = jnp.dtype(x.dtype).itemsize
    o_isz = out_dtype.itemsize
    B_pad = _round_up(B, 8)

    O128 = _round_up(O, 128)
    I128 = _round_up(I, 128)

    TO = _round_up(min(block_out, O128), 128)
    # Give the "parallel" out axis at least two tiles (v7x dual-TC split).
    if O128 > 128 and _cdiv(O128, TO) < 2:
        TO = _round_up(_cdiv(O128, 2), 128)
    TI = _round_up(min(block_in, I128), 128)

    def _vmem_needed(ti, to):
        wb = 2 * E * ti * to * w_isz                    # double-buffered weights
        xb = B_pad * _round_up(I, ti) * x_isz           # resident input
        ob = 2 * B_pad * to * o_isz                     # output blocks
        ab = 0 if acc_in_output else B_pad * to * 4     # f32 accumulator scratch
        bb = 2 * to * 4                                 # pre-mixed bias
        return wb + xb + ob + ab + bb + (2 << 20)       # + headroom

    # Shrink TI first (keeps output lane-dense / wide), then TO.
    while _vmem_needed(TI, TO) > budget:
        if TI > 128:
            TI = max(128, _round_up(TI // 2, 128))
        elif TO > 128:
            TO = max(128, _round_up(TO // 2, 128))
        else:
            break

    I_pad = _round_up(I, TI)
    O_pad = _round_up(O, TO)
    n_k = I_pad // TI
    n_o = O_pad // TO

    # ---- one-time layout work (cast / pad / pre-tile / pre-mix) ------------
    w = weight.astype(w_dtype)
    if O_pad != O or I_pad != I:
        w = jnp.pad(w, ((0, 0), (0, O_pad - O), (0, I_pad - I)))
    # (E, O_pad, I_pad) -> (n_o, n_k, E, TI, TO): each grid step's weight block
    # is a single contiguous HBM region, K-major for lane-dense O output.
    w_tiled = jnp.transpose(w.reshape(E, n_o, TO, n_k, TI), (1, 3, 0, 4, 2))

    x_p = x if I_pad == I else jnp.pad(x, ((0, 0), (0, I_pad - I)))
    # (B, I_pad) -> (n_k, B, TI): whole input stays VMEM-resident, indexed by k.
    x_tiled = jnp.transpose(x_p.reshape(B, n_k, TI), (1, 0, 2))

    if bias is not None:
        mixed_b = jnp.sum(ew[:, None] * bias.astype(jnp.float32), axis=0)   # (O,)
    else:
        mixed_b = jnp.zeros((O,), dtype=jnp.float32)
    if O_pad != O:
        mixed_b = jnp.pad(mixed_b, (0, O_pad - O))
    mixed_b = mixed_b.reshape(1, O_pad)

    vmem_limit = int(min(budget, max(32 << 20, _vmem_needed(TI, TO) + (8 << 20))))

    kernel = _make_moe_kernel(acc_in_output)
    scratch_shapes = [] if acc_in_output else [pltpu.VMEM((B, TO), jnp.float32)]

    out = pl.pallas_call(
        kernel,
        out_shape=jax.ShapeDtypeStruct((B, O_pad), out_dtype),
        grid=(n_o, n_k),
        in_specs=[
            pl.BlockSpec(memory_space=pltpu.MemorySpace.SMEM),            # ew
            pl.BlockSpec((n_k, B, TI), lambda o, k: (0, 0, 0)),           # x (resident)
            pl.BlockSpec((None, None, E, TI, TO),
                         lambda o, k: (o, k, 0, 0, 0)),                   # weight tile
            pl.BlockSpec((1, TO), lambda o, k: (0, o)),                   # mixed bias
        ],
        out_specs=pl.BlockSpec((B, TO), lambda o, k: (0, o)),
        scratch_shapes=scratch_shapes,
        compiler_params=pltpu.CompilerParams(
            dimension_semantics=("parallel", "arbitrary"),
            vmem_limit_bytes=vmem_limit),
    )(ew, x_tiled, w_tiled, mixed_b)

    if O_pad != O:
        out = out[:, :O]
    return out


def init_params(key, num_expert, in_features, out_features):
    """Deterministic init mimicking nn.Linear-style kaiming_uniform(a=sqrt(5))."""
    kw, kb = jax.random.split(key)
    fan_in = in_features
    bound = 1.0 / math.sqrt(fan_in)
    weight = jax.random.uniform(
        kw, (num_expert, out_features, in_features),
        minval=-bound, maxval=bound, dtype=jnp.float32)
    bias = jax.random.uniform(
        kb, (num_expert, out_features),
        minval=-bound, maxval=bound, dtype=jnp.float32)
    return weight, bias


if __name__ == "__main__":
    key = jax.random.PRNGKey(0)
    k_params, k_x, k_ew = jax.random.split(key, 3)

    num_expert = 4
    in_features = 512
    out_features = 256
    batch = 8

    weight, bias = init_params(k_params, num_expert, in_features, out_features)
    x = jax.random.normal(k_x, (batch, in_features), dtype=jnp.float32)
    # softmax-normalized expert weights (typical MoE gating output)
    expert_weights = jax.nn.softmax(
        jax.random.normal(k_ew, (num_expert,), dtype=jnp.float32))

    # Pure-JAX reference (same math as the PyTorch forward).
    mixed_w = jnp.sum(expert_weights[:, None, None] * weight, axis=0)
    mixed_b = jnp.sum(expert_weights[:, None] * bias, axis=0)
    ref = jnp.dot(x, mixed_w.T,
                  precision=jax.lax.Precision.HIGHEST) + mixed_b[None, :]

    # 1) f32 path with small tiles: exercises multi-o parallel axis, multi-k
    #    reduction, accumulate-in-output, and the resident-x dynamic index.
    out = moe_classifier(x, expert_weights, weight, bias,
                         block_out=128, block_in=128)
    out = jax.block_until_ready(out)
    assert out.shape == (batch, out_features)
    max_err = jnp.max(jnp.abs(out - ref))
    assert jnp.allclose(out, ref, atol=1e-3, rtol=1e-3), \
        f"f32 path max abs err {max_err}"

    # 2) bf16-weight path with default (generation-aware) tiles: halves
    #    streamed weight bytes on this HBM-bound kernel; f32 accumulation.
    out_bf16 = moe_classifier(x, expert_weights, weight, bias,
                              weights_dtype=jnp.bfloat16)
    out_bf16 = jax.block_until_ready(out_bf16)
    assert out_bf16.shape == (batch, out_features)
    max_err_bf16 = jnp.max(jnp.abs(out_bf16 - ref))
    assert jnp.allclose(out_bf16, ref, atol=2e-2, rtol=2e-2), \
        f"bf16 path max abs err {max_err_bf16}"

    print("KERNEL_OK")
</pallas_src>

<mosaic_0001>
module attributes {stable_mosaic.version = 11 : i64} {
  func.func @kernel(%arg0: i32, %arg1: i32, %arg2: memref<4xf32, #tpu.memory_space<smem>>, %arg3: memref<4x8x128xf32, #tpu.memory_space<vmem>>, %arg4: memref<1x1x4x128x128xf32, #tpu.memory_space<vmem>>, %arg5: memref<1x128xf32, #tpu.memory_space<vmem>>, %arg6: memref<8x128xf32, #tpu.memory_space<vmem>>) attributes {dimension_semantics = [#tpu.dimension_semantics<parallel>, #tpu.dimension_semantics<arbitrary>], iteration_bounds = array<i64: 2, 4>, scalar_prefetch = 0 : i64, scratch_operands = 0 : i64, tpu.core_type = #tpu.core_type<tc>, window_params = [{transform_indices = @transform_0, window_bounds = array<i64: 4>}, {pipeline_mode = #tpu.pipeline_mode<synchronous>, transform_indices = @transform_1, window_bounds = array<i64: 4, 8, 128>}, {transform_indices = @transform_2, window_bounds = array<i64: 1, 1, 4, 128, 128>}, {transform_indices = @transform_3, window_bounds = array<i64: 1, 128>}, {transform_indices = @transform_4, window_bounds = array<i64: 8, 128>}]} {
    %c0_i32 = arith.constant 0 : i32
    %0 = arith.cmpi eq, %arg1, %c0_i32 : i32
    %1 = arith.extui %0 : i1 to i32
    %c0_i32_0 = arith.constant 0 : i32
    %2 = arith.cmpi ne, %1, %c0_i32_0 : i32
    scf.if %2 {
      %cst_31 = arith.constant 0.000000e+00 : f32
      %39 = vector.broadcast %cst_31 : f32 to vector<8x128xf32>
      %c0_32 = arith.constant 0 : index
      %c0_33 = arith.constant 0 : index
      %40 = vector.load %arg6[%c0_32, %c0_33] : memref<8x128xf32, #tpu.memory_space<vmem>>, vector<8x128xf32>
      tpu.vector_store %arg6[%c0_32, %c0_33], %39 {strides = array<i32>} : memref<8x128xf32, #tpu.memory_space<vmem>>, vector<8x128xf32>,
    } else {
    }
    %3 = arith.index_cast %arg1 : i32 to index
    %c0 = arith.constant 0 : index
    %c0_1 = arith.constant 0 : index
    %4 = vector.load %arg3[%3, %c0, %c0_1] : memref<4x8x128xf32, #tpu.memory_space<vmem>>, vector<1x8x128xf32>
    %5 = vector.shape_cast %4 : vector<1x8x128xf32> to vector<8x128xf32>
    %c0_2 = arith.constant 0 : index
    %c0_3 = arith.constant 0 : index
    %6 = vector.load %arg6[%c0_2, %c0_3] : memref<8x128xf32, #tpu.memory_space<vmem>>, vector<8x128xf32>
    %c0_4 = arith.constant 0 : index
    %7 = memref.load %arg2[%c0_4] : memref<4xf32, #tpu.memory_space<smem>>
    %c0_5 = arith.constant 0 : index
    %c0_6 = arith.constant 0 : index
    %c0_7 = arith.constant 0 : index
    %c0_8 = arith.constant 0 : index
    %c0_9 = arith.constant 0 : index
    %8 = vector.load %arg4[%c0_5, %c0_6, %c0_7, %c0_8, %c0_9] : memref<1x1x4x128x128xf32, #tpu.memory_space<vmem>>, vector<1x1x1x128x128xf32>
    %9 = vector.shape_cast %8 : vector<1x1x1x128x128xf32> to vector<128x128xf32>
    %cst = arith.constant dense<0.000000e+00> : vector<8x128xf32>
    %10 = tpu.matmul %5, %9, %cst {dimension_numbers = #tpu.dot_dimension_numbers<[1], [0], [0], [1], [0, 0, 1, 1], [], []>} : vector<8x128xf32>, vector<128x128xf32>, vector<8x128xf32> -> vector<8x128xf32>
    %11 = vector.broadcast %7 : f32 to vector<8x128xf32>
    %12 = arith.mulf %11, %10 : vector<8x128xf32>
    %13 = arith.addf %6, %12 : vector<8x128xf32>
    %c1 = arith.constant 1 : index
    %14 = memref.load %arg2[%c1] : memref<4xf32, #tpu.memory_space<smem>>
    %c0_10 = arith.constant 0 : index
    %c0_11 = arith.constant 0 : index
    %c1_12 = arith.constant 1 : index
    %c0_13 = arith.constant 0 : index
    %c0_14 = arith.constant 0 : index
    %15 = vector.load %arg4[%c0_10, %c0_11, %c1_12, %c0_13, %c0_14] : memref<1x1x4x128x128xf32, #tpu.memory_space<vmem>>, vector<1x1x1x128x128xf32>
    %16 = vector.shape_cast %15 : vector<1x1x1x128x128xf32> to vector<128x128xf32>
    %cst_15 = arith.constant dense<0.000000e+00> : vector<8x128xf32>
    %17 = tpu.matmul %5, %16, %cst_15 {dimension_numbers = #tpu.dot_dimension_numbers<[1], [0], [0], [1], [0, 0, 1, 1], [], []>} : vector<8x128xf32>, vector<128x128xf32>, vector<8x128xf32> -> vector<8x128xf32>
    %18 = vector.broadcast %14 : f32 to vector<8x128xf32>
    %19 = arith.mulf %18, %17 : vector<8x128xf32>
    %20 = arith.addf %13, %19 : vector<8x128xf32>
    %c2 = arith.constant 2 : index
    %21 = memref.load %arg2[%c2] : memref<4xf32, #tpu.memory_space<smem>>
    %c0_16 = arith.constant 0 : index
    %c0_17 = arith.constant 0 : index
    %c2_18 = arith.constant 2 : index
    %c0_19 = arith.constant 0 : index
    %c0_20 = arith.constant 0 : index
    %22 = vector.load %arg4[%c0_16, %c0_17, %c2_18, %c0_19, %c0_20] : memref<1x1x4x128x128xf32, #tpu.memory_space<vmem>>, vector<1x1x1x128x128xf32>
    %23 = vector.shape_cast %22 : vector<1x1x1x128x128xf32> to vector<128x128xf32>
    %cst_21 = arith.constant dense<0.000000e+00> : vector<8x128xf32>
    %24 = tpu.matmul %5, %23, %cst_21 {dimension_numbers = #tpu.dot_dimension_numbers<[1], [0], [0], [1], [0, 0, 1, 1], [], []>} : vector<8x128xf32>, vector<128x128xf32>, vector<8x128xf32> -> vector<8x128xf32>
    %25 = vector.broadcast %21 : f32 to vector<8x128xf32>
    %26 = arith.mulf %25, %24 : vector<8x128xf32>
    %27 = arith.addf %20, %26 : vector<8x128xf32>
    %c3 = arith.constant 3 : index
    %28 = memref.load %arg2[%c3] : memref<4xf32, #tpu.memory_space<smem>>
    %c0_22 = arith.constant 0 : index
    %c0_23 = arith.constant 0 : index
    %c3_24 = arith.constant 3 : index
    %c0_25 = arith.constant 0 : index
    %c0_26 = arith.constant 0 : index
    %29 = vector.load %arg4[%c0_22, %c0_23, %c3_24, %c0_25, %c0_26] : memref<1x1x4x128x128xf32, #tpu.memory_space<vmem>>, vector<1x1x1x128x128xf32>
    %30 = vector.shape_cast %29 : vector<1x1x1x128x128xf32> to vector<128x128xf32>
    %cst_27 = arith.constant dense<0.000000e+00> : vector<8x128xf32>
    %31 = tpu.matmul %5, %30, %cst_27 {dimension_numbers = #tpu.dot_dimension_numbers<[1], [0], [0], [1], [0, 0, 1, 1], [], []>} : vector<8x128xf32>, vector<128x128xf32>, vector<8x128xf32> -> vector<8x128xf32>
    %32 = vector.broadcast %28 : f32 to vector<8x128xf32>
    %33 = arith.mulf %32, %31 : vector<8x128xf32>
    %34 = arith.addf %27, %33 : vector<8x128xf32>
    %c0_28 = arith.constant 0 : index
    %c0_29 = arith.constant 0 : index
    %35 = vector.load %arg6[%c0_28, %c0_29] : memref<8x128xf32, #tpu.memory_space<vmem>>, vector<8x128xf32>
    tpu.vector_store %arg6[%c0_28, %c0_29], %34 {strides = array<i32>} : memref<8x128xf32, #tpu.memory_space<vmem>>, vector<8x128xf32>,
    %c3_i32 = arith.constant 3 : i32
    %36 = arith.cmpi eq, %arg1, %c3_i32 : i32
    %37 = arith.extui %36 : i1 to i32
    %c0_i32_30 = arith.constant 0 : i32
    %38 = arith.cmpi ne, %37, %c0_i32_30 : i32
    scf.if %38 {
      %c0_31 = arith.constant 0 : index
      %c0_32 = arith.constant 0 : index
      %39 = vector.load %arg5[%c0_31, %c0_32] : memref<1x128xf32, #tpu.memory_space<vmem>>, vector<1x128xf32>
      %c0_33 = arith.constant 0 : index
      %c0_34 = arith.constant 0 : index
      %40 = vector.load %arg6[%c0_33, %c0_34] : memref<8x128xf32, #tpu.memory_space<vmem>>, vector<8x128xf32>
      %41 = vector.broadcast %39 : vector<1x128xf32> to vector<8x128xf32>
      %42 = arith.addf %40, %41 : vector<8x128xf32>
      %c0_35 = arith.constant 0 : index
      %c0_36 = arith.constant 0 : index
      %43 = vector.load %arg6[%c0_35, %c0_36] : memref<8x128xf32, #tpu.memory_space<vmem>>, vector<8x128xf32>
      tpu.vector_store %arg6[%c0_35, %c0_36], %42 {strides = array<i32>} : memref<8x128xf32, #tpu.memory_space<vmem>>, vector<8x128xf32>,
    } else {
    }
    return
  }
  func.func @transform_0(%arg0: i32, %arg1: i32) -> i32 {
    %c0_i32 = arith.constant 0 : i32
    %c0_i32_0 = arith.constant 0 : i32
    return %c0_i32 : i32
  }
  func.func @transform_1(%arg0: i32, %arg1: i32) -> (i32, i32, i32) {
    %c0_i32 = arith.constant 0 : i32
    %c0_i32_0 = arith.constant 0 : i32
    %c0_i32_1 = arith.constant 0 : i32
    %c0_i32_2 = arith.constant 0 : i32
    return %c0_i32, %c0_i32_0, %c0_i32_1 : i32, i32, i32
  }
  func.func @transform_2(%arg0: i32, %arg1: i32) -> (i32, i32, i32, i32, i32) {
    %c0_i32 = arith.constant 0 : i32
    %c0_i32_0 = arith.constant 0 : i32
    %c0_i32_1 = arith.constant 0 : i32
    %c0_i32_2 = arith.constant 0 : i32
    return %arg0, %arg1, %c0_i32, %c0_i32_0, %c0_i32_1 : i32, i32, i32, i32, i32
  }
  func.func @transform_3(%arg0: i32, %arg1: i32) -> (i32, i32) {
    %c0_i32 = arith.constant 0 : i32
    %c0_i32_0 = arith.constant 0 : i32
    return %c0_i32, %arg0 : i32, i32
  }
  func.func @transform_4(%arg0: i32, %arg1: i32) -> (i32, i32) {
    %c0_i32 = arith.constant 0 : i32
    %c0_i32_0 = arith.constant 0 : i32
    return %c0_i32, %arg0 : i32, i32
  }
}

</mosaic_0001>

<bundles_post_ra>
// kernel: tpu_custom_call.1
= control target key start
LH: loop header
LB: loop body
LE: loop exit
PB: predicated region body
PF: predicated region fallthrough
CT: control target
= control target key end

     0   :  { %s1425_s0 = inlined_call_operand.hbm [shape: f32[4], index: 0, kind: input, shape index: {}]   ;;  %s1426_s1 = inlined_call_operand.hbm [shape: f32[4,8,128], index: 1, kind: input, shape index: {}]   ;;  %s1427_s2 = inlined_call_operand.hbm [shape: f32[2,4,4,128,128], index: 2, kind: input, shape index: {}]   ;;  %s1428_s3 = inlined_call_operand.hbm [shape: f32[1,256], index: 3, kind: input, shape index: {}]   ;;  %s1429_s4 = inlined_call_operand.hbm [shape: f32[8,256], index: 4, kind: output, shape index: {}]  }
   0x1   :  { %1436 = sst [smem:[#allocation19_spill]] %s1425_s0 }
   0x2   :  { %1437 = sst [smem:[#allocation20_spill]] %s1426_s1 }
   0x3   :  { %1438 = sst [smem:[#allocation21_spill]] %s1427_s2 }
   0x4   :  { %1439 = sst [smem:[#allocation22_spill]] %s1429_s4 }
   0x5   :  { %9 = vsyncpa [#allocation5], 0 }
   0x6   :  { %10 = vsyncpa [#allocation3], 0 }
   0x7   :  { %11 = vsyncpa [#allocation8], 0 }
   0x8   :  { %13 = vsyncpa [#allocation8 + $0x1], 0 }
   0x9   :  { %14 = vsyncpa [#allocation4], 0 }
   0xa   :  { %16 = vsyncpa [#allocation4 + $0x1], 0  ;;  %s1099_s15 = smov 0   ;;  %s1101_s16 = smov 0  }
   0xb   :  { %s1103_s17 = smov 0   ;;  %s1105_s18 = smov 0  }
   0xc   :  { %s1107_s19 = smov 0   ;;  %s1109_s20 = smov 0  }
   0xd   :  { %s1111_s21 = smov 0   ;;  %s1113_s22 = smov 0  }
   0xe   :  { %s1115_s23 = smov 0   ;;  %s1117_s24 = smov 0  }
   0xf   :  { %s1119_s25 = smov 0  }
  0x10 LB: > { %1440 = sst [smem:[#allocation16_spill]] %s1059_s23  ;;  %s31_s26 = sadd.s32 1, %s1059_s23  ;;  %s1067_s25 = sphi %s1119_s25, %s22_s25   ;;  %s1063_s24 = sphi %s1117_s24, %s1466_s24   ;;  %s1059_s23 = sphi %s1115_s23, %s1457_s23   ;;  %s1055_s22 = sphi %s1113_s22, %s1465_s22   ;;  %s1051_s21 = sphi %s1111_s21, %s1456_s21   ;;  %s1047_s20 = sphi %s1109_s20, %s1464_s20   ;;  %s1043_s19 = sphi %s1107_s19, %s1463_s19   ;;  %s1039_s18 = sphi %s1105_s18, %s1462_s18   ;;  %s1035_s17 = sphi %s1103_s17, %s1461_s17   ;;  %s1031_s16 = sphi %s1101_s16, %s1460_s16   ;;  %s1027_s15 = sphi %s1099_s15, %s1459_s15  }
  0x11   : > { %s34_s27 = sadd.s32 1, %s1063_s24  ;;  %p32_p0 = scmp.ge.s32.totalorder %s31_s26, 4 }
  0x12   : > { %s85_s28 = sadd.s32 1, %s1047_s20  ;;  %p92_p1 = scmp.ne.s32.totalorder %s1047_s20, %s1043_s19 }
  0x13   : > { %p93_p2 = scmp.eq.s32.totalorder %s1067_s25, 0  ;;  %s1468_s26 = smov (%p32_p0, %s31_s26), 0 }
  0x14   : > { %1441 = sst [smem:[#allocation17_spill]] %s1468_s26  ;;  %s1470_s27 = smov (!%p32_p0, %s34_s27), %s1063_s24 }
  0x15   : > { %s81_s29 = ssub.s32 %s1059_s23, %s1468_s26  ;;  %p1167_p3 = por %p93_p2, %p92_p1 }
  0x16   : > { %p36_p4 = scmp.ge.s32.totalorder %s1470_s27, 2  ;;  %p730_p5 = scmp.lt.s32.totalorder %s1067_s25, 8 }
  0x17   : > { %s198_s5 = sand.u32 1, %s1067_s25   ;;  %s200_s8 = sand.u32 1, %s1047_s20  }
  0x18   : > { %s1472_s27 = smov (%p36_p4, %s1470_s27), 0  ;;  %s629_s9 = sshll.u32 %s200_s8, 9 }
  0x19   : > { %1443 = sst [smem:[#allocation18_spill]] %s1472_s27  ;;  %s1177_s6 = ssub.s32 %s1063_s24, %s1472_s27 }
  0x1a   : > { %s82_s7 = sor.u32 %s81_s29, %s1177_s6  ;;  %p109_p6 = scmp.eq.s32.totalorder %s1177_s6, 0 }
  0x1b   : > { %p83_p7 = scmp.eq.s32.totalorder %s82_s7, 0  ;;  %s630_s10 = sshll.u32 %s1059_s23, 6 }
  0x1c   : > { %s631_s12 = sshll.u32 %s1063_s24, 8  ;;  %s202_s14 = scalar_lea.vmem [#allocation7], %s629_s9 }
  0x1d   : > { %s1184_s11 = scalar_select %p83_p7, %s1047_s20, %s85_s28  }
  0x1e   : > { %s207_s13 = sadd.s32 %s631_s12, %s630_s10  ;;  %s212_s27 = sshll.u32 %s202_s14, 4  ;;  %s213_s27 = int_to_ptr.vmem [resolvable:$true] %s212_s27 }
  0x1f   : > { %s632_s26 = sshll.u32 %s207_s13, 3  ;;  %s1444_s2 = sld [smem:[#allocation21_spill]] }
  0x20   : > { %p718_p8 = pnand %p730_p5, %p1167_p3  ;;  %s1194_s8 = scalar_lea.sflag [#allocation8], %s198_s5 }
  0x21   : > { %s1433_s9 = smov 128   ;;  %s1434_s10 = smov 8  }
  0x22   : > { %s1201_s12 = sadd.s32 4294967295, %s1067_s25   ;;  %s624_s4 = sadd.s32 4294967294, %s1067_s25  }
  0x23   : > { %p98_p9 = scmp.ne.s32.totalorder %s1043_s19, %s1039_s18  ;;  %p99_p10 = scmp.eq.s32.totalorder %s1201_s12, 0 }
  0x24   : > { %p124_p11 = scmp.ne.s32.totalorder %s1031_s16, %s1027_s15  ;;  %p148_p12 = scmp.eq.s32.totalorder %s1201_s12, 7 }
  0x25   : > { %s209_s7 = scalar_lea.hbm %s1444_s2, %s632_s26  ;;  %p154_p13 = scmp.eq.s32.totalorder %s624_s4, 7 }
  0x26   : > { %s210_s28 = sshll.u32 %s209_s7, 4  ;;  %p1212_p0 = por %p99_p10, %p98_p9  ;;  %s211_s28 = int_to_ptr.hbm [resolvable:$true] %s210_s28 }
  0x27   : > { %720 = dma.hbm_to_vmem [thread:$0]  (!%p718_p8), %s211_s28, 8192, %s213_s27, %s1194_s8, %s1433_s9, %s1433_s9, %s1434_s10  }
  0x28   : > { %p1218_p1 = por %p124_p11, %p99_p10  ;;  %p1222_p3 = por %p154_p13, %p124_p11 }
  0x29   : > { %p625_p4 = scmp.ge.s32.totalorder %s1067_s25, 1  ;;  %p161_p7 = scmp.lt.s32.totalorder %s1067_s25, 9 }
  0x2a   : > { %s1448_s0 = sld [smem:[#allocation19_spill]]  ;;  %s1071_s4 = smov [#allocation6]  }
  0x2b   : > { %p1231_p8 = pnand %p625_p4, %p161_p7  ;;  %s1450_s1 = sld [smem:[#allocation20_spill]] }
  0x2c   : > { %s184_s18 = sshll.u32 %s1071_s4, 4  ;;  %s228_s10 = scalar_lea.hbm %s1428_s3, %s1063_s24  ;;  %s185_s18 = int_to_ptr.vmem [resolvable:$true] %s184_s18 }
  0x2d   : > { %p710_p9 = pneg %p1231_p8  ;;  %s1072_s2 = smov [#allocation2]  }
  0x2e   : > { %s1451_s29 = smov 8   ;;  %s1452_s7 = smov 128  }
  0x2f   : > { %p711_p11 = pnand %p710_p9, %p99_p10  ;;  %p118_p13 = scmp.ne.s32.totalorder %s1035_s17, %s1031_s16 }
  0x30   : > { %s173_s13 = sshll.u32 %s1448_s0, 4  ;;  %s111_s0 = sadd.s32 1, %s1035_s17  ;;  %s174_s13 = int_to_ptr.hbm [resolvable:$true] %s173_s13 }
  0x31   : > { %s182_s28 = sshll.u32 %s1450_s1, 4  ;;  %s224_s4 = sand.u32 1, %s1035_s17   ;;  %s183_s28 = int_to_ptr.hbm [resolvable:$true] %s182_s28 }
  0x32   : > { %713 = dma.hbm_to_smem (!%p711_p11), %s174_s13, 16, %s1072_s2, [#allocation5]  }
  0x33   : > { %716 = dma.hbm_to_vmem [thread:$0]  (!%p711_p11), %s183_s28, 512, %s185_s18, [#allocation3], %s1452_s7, %s1452_s7, %s1451_s29  }
  0x34   : > { %s1253_s1 = scalar_select %p109_p6, %s1035_s17, %s111_s0  }
  0x35   : > { %s230_s23 = sshll.u32 %s228_s10, 4  ;;  %p120_p4 = por %p118_p13, %p93_p2  ;;  %s231_s23 = int_to_ptr.hbm [resolvable:$true] %s230_s23 }
  0x36   : > { %p1262_p7 = por %p148_p12, %p118_p13  ;;  %s225_s5 = scalar_lea.vmem [#allocation9], %s224_s4 }
  0x37   : > { %s232_s2 = sshll.u32 %s225_s5, 4  ;;  %p721_p9 = pnand %p730_p5, %p120_p4  ;;  %s233_s2 = int_to_ptr.vmem [resolvable:$true] %s232_s2 }
  0x38   : > { %241 = sbr.rel (%p1231_p8) target bundleno = 284 (0x11c), region = 36 }
  0x39   : > { %723 = dma.hbm_to_vmem [thread:$0]  (!%p721_p9), %s231_s23, 16, %s233_s2, %s1194_s8  }
  0x3d   : > { %1006 = dma.done.wait (%p99_p10), [#allocation5], 16  }
  0x3e   : > { %1008 = vsyncadd (%p99_p10), [#allocation5], 4294967280 }
  0x3f   : > { %1010 = dma.done.wait (%p99_p10), [#allocation3], 512  }
  0x40   : > { %1012 = vsyncadd (%p99_p10), [#allocation3], 4294966784  ;;  %s253_s0 = sand.u32 1, %s1201_s12   ;;  %s255_s23 = sand.u32 1, %s1043_s19  }
  0x41   : > { %s636_s6 = sshll.u32 %s255_s23, 9  ;;  %s254_s8 = scalar_lea.sflag [#allocation8], %s253_s0 }
  0x42   : > { %s1281_s10 = scalar_lea.vmem [#allocation7], %s636_s6 }
  0x43   : > { %1014 = dma.done.wait (%p1212_p0), %s254_s8, 8192  }
  0x44   : > { %1016 = vsyncadd (%p1212_p0), %s254_s8, 4294959104  ;;  %s1288_s13 = sand.u32 1, %s1031_s16  }
  0x45   : > { %s266_s14 = scalar_lea.vmem [#allocation9], %s1288_s13 }
  0x46   : > { %1018 = dma.done.wait (%p1218_p1), %s254_s8, 16  }
  0x47   : > { %1020 = vsyncadd (%p1218_p1), %s254_s8, 4294967280 }
  0x48   : > { %272 = sfence }
  0x49   : > { %s637_s12 = sshll.u32 %s1288_s13, 3  ;;  %p638_p2 = scmp.ne.s32.totalorder %s1051_s21, 0 }
  0x4a   : > { %s1296_s28 = scalar_lea.vmem [#allocation10], %s637_s12 }
  0x4b   : > { %300 = sbr.rel (%p638_p2) target bundleno = 82 (0x52), region = 56 }
  0x50   : > { %v1073_v0 = vmov 0.0  }
  0x51   : > { %301 = vst [vmem:[%s1296_s28] sm:$0xff] %v1073_v0 }
  0x52 PF: > { %v673_v1 = vld [vmem:[%s1281_s10 + $0x178] sm:$0xff]  ;;  %v672_v3 = vld [vmem:[%s1281_s10 + $0x170] sm:$0xff]  ;;  %v671_v7 = vld [vmem:[%s1281_s10 + $0x168] sm:$0xff]  ;;  %s639_s26 = sshll.u32 %s1051_s21, 3  ;;  %s306_s18 = sld [smem:[#allocation2]] }
  0x53   : > { %v322_v2 = vld [vmem:[%s1281_s10 + $0x78] sm:$0xff]  ;;  %405 = vmatpush.msra.mxu2 %v673_v1  ;;  %v321_v5 = vld [vmem:[%s1281_s10 + $0x70] sm:$0xff]  ;;  %v320_v9 = vld [vmem:[%s1281_s10 + $0x68] sm:$0xff]  ;;  %s303_s27 = scalar_lea.vmem [#allocation6], %s639_s26  ;;  %s640_s29 = sld [smem:[#allocation2 + $0x1]] }
  0x54   : > { %323 = vmatpush.msra.mxu0 %v322_v2  ;;  %v690_v4 = vld [vmem:[%s1281_s10 + $0x1f8] sm:$0xff]  ;;  %v689_v8 = vld [vmem:[%s1281_s10 + $0x1f0] sm:$0xff]  ;;  %v688_v11 = vld [vmem:[%s1281_s10 + $0x1e8] sm:$0xff]  ;;  %s657_s7 = sld [smem:[#allocation2 + $0x2]]  ;;  %p691_p5 = scmp.ne.s32.totalorder %s1051_s21, 3 }
  0x55   : > { %v656_v6 = vld [vmem:[%s1281_s10 + $0xf8] sm:$0xff]  ;;  %446 = vmatpush.msra.mxu3 %v690_v4  ;;  %406 = vmatpush.msra.mxu2 %v672_v3  ;;  %v655_v10 = vld [vmem:[%s1281_s10 + $0xf0] sm:$0xff]  ;;  %v670_v12 = vld [vmem:[%s1281_s10 + $0x160] sm:$0xff]  ;;  %s674_s4 = sld [smem:[#allocation2 + $0x3]] }
  0x56   : > { %364 = vmatpush.msra.mxu1 %v656_v6  ;;  %324 = vmatpush.msra.mxu0 %v321_v5  ;;  %v319_v13 = vld [vmem:[%s1281_s10 + $0x60] sm:$0xff]  ;;  %v654_v14 = vld [vmem:[%s1281_s10 + $0xe8] sm:$0xff]  ;;  %v669_v17 = vld [vmem:[%s1281_s10 + $0x158] sm:$0xff] }
  0x57   : > { %447 = vmatpush.msra.mxu3 %v689_v8  ;;  %407 = vmatpush.msra.mxu2 %v671_v7  ;;  %v687_v15 = vld [vmem:[%s1281_s10 + $0x1e0] sm:$0xff]  ;;  %v318_v18 = vld [vmem:[%s1281_s10 + $0x58] sm:$0xff]  ;;  %v668_v21 = vld [vmem:[%s1281_s10 + $0x150] sm:$0xff] }
  0x58   : > { %365 = vmatpush.msra.mxu1 %v655_v10  ;;  %325 = vmatpush.msra.mxu0 %v320_v9  ;;  %v653_v16 = vld [vmem:[%s1281_s10 + $0xe0] sm:$0xff]  ;;  %v686_v19 = vld [vmem:[%s1281_s10 + $0x1d8] sm:$0xff]  ;;  %v317_v22 = vld [vmem:[%s1281_s10 + $0x50] sm:$0xff]  ;;  %v343_v2 = vstv %s306_s18 }
  0x59   : > { %448 = vmatpush.msra.mxu3 %v688_v11  ;;  %408 = vmatpush.msra.mxu2 %v670_v12  ;;  %v652_v20 = vld [vmem:[%s1281_s10 + $0xd8] sm:$0xff]  ;;  %v685_v23 = vld [vmem:[%s1281_s10 + $0x1d0] sm:$0xff]  ;;  %v667_v25 = vld [vmem:[%s1281_s10 + $0x148] sm:$0xff]  ;;  %v384_v5 = vstv %s640_s29 }
  0x5a   : > { %366 = vmatpush.msra.mxu1 %v654_v14  ;;  %326 = vmatpush.msra.mxu0 %v319_v13  ;;  %v651_v24 = vld [vmem:[%s1281_s10 + $0xd0] sm:$0xff]  ;;  %v316_v26 = vld [vmem:[%s1281_s10 + $0x48] sm:$0xff]  ;;  %v666_v29 = vld [vmem:[%s1281_s10 + $0x140] sm:$0xff]  ;;  %v425_v10 = vstv %s657_s7 }
  0x5b   : > { %449 = vmatpush.msra.mxu3 %v687_v15  ;;  %409 = vmatpush.msra.mxu2 %v669_v17  ;;  %v684_v27 = vld [vmem:[%s1281_s10 + $0x1c8] sm:$0xff]  ;;  %v315_v30 = vld [vmem:[%s1281_s10 + $0x40] sm:$0xff]  ;;  %v665_v33 = vld [vmem:[%s1281_s10 + $0x138] sm:$0xff]  ;;  %v466_v11 = vstv %s674_s4 }
  0x5c   : > { %367 = vmatpush.msra.mxu1 %v653_v16  ;;  %327 = vmatpush.msra.mxu0 %v318_v18  ;;  %v650_v28 = vld [vmem:[%s1281_s10 + $0xc8] sm:$0xff]  ;;  %v683_v31 = vld [vmem:[%s1281_s10 + $0x1c0] sm:$0xff]  ;;  %v314_v34 = vld [vmem:[%s1281_s10 + $0x38] sm:$0xff] }
  0x5d   : > { %450 = vmatpush.msra.mxu3 %v686_v19  ;;  %410 = vmatpush.msra.mxu2 %v668_v21  ;;  %v649_v32 = vld [vmem:[%s1281_s10 + $0xc0] sm:$0xff]  ;;  %v682_v35 = vld [vmem:[%s1281_s10 + $0x1b8] sm:$0xff]  ;;  %v664_v37 = vld [vmem:[%s1281_s10 + $0x130] sm:$0xff] }
  0x5e   : > { %368 = vmatpush.msra.mxu1 %v652_v20  ;;  %328 = vmatpush.msra.mxu0 %v317_v22  ;;  %v648_v36 = vld [vmem:[%s1281_s10 + $0xb8] sm:$0xff]  ;;  %v313_v38 = vld [vmem:[%s1281_s10 + $0x30] sm:$0xff]  ;;  %v663_v41 = vld [vmem:[%s1281_s10 + $0x128] sm:$0xff] }
  0x5f   : > { %451 = vmatpush.msra.mxu3 %v685_v23  ;;  %411 = vmatpush.msra.mxu2 %v667_v25  ;;  %v681_v39 = vld [vmem:[%s1281_s10 + $0x1b0] sm:$0xff]  ;;  %v312_v42 = vld [vmem:[%s1281_s10 + $0x28] sm:$0xff]  ;;  %v662_v45 = vld [vmem:[%s1281_s10 + $0x120] sm:$0xff] }
  0x60   : > { %369 = vmatpush.msra.mxu1 %v651_v24  ;;  %329 = vmatpush.msra.mxu0 %v316_v26  ;;  %v647_v40 = vld [vmem:[%s1281_s10 + $0xb0] sm:$0xff]  ;;  %v680_v43 = vld [vmem:[%s1281_s10 + $0x1a8] sm:$0xff]  ;;  %v311_v46 = vld [vmem:[%s1281_s10 + $0x20] sm:$0xff] }
  0x61   : > { %452 = vmatpush.msra.mxu3 %v684_v27  ;;  %412 = vmatpush.msra.mxu2 %v666_v29  ;;  %v646_v44 = vld [vmem:[%s1281_s10 + $0xa8] sm:$0xff]  ;;  %v679_v47 = vld [vmem:[%s1281_s10 + $0x1a0] sm:$0xff]  ;;  %v661_v49 = vld [vmem:[%s1281_s10 + $0x118] sm:$0xff] }
  0x62   : > { %370 = vmatpush.msra.mxu1 %v650_v28  ;;  %330 = vmatpush.msra.mxu0 %v315_v30  ;;  %v645_v48 = vld [vmem:[%s1281_s10 + $0xa0] sm:$0xff]  ;;  %v310_v50 = vld [vmem:[%s1281_s10 + $0x18] sm:$0xff]  ;;  %v660_v53 = vld [vmem:[%s1281_s10 + $0x110] sm:$0xff] }
  0x63   : > { %453 = vmatpush.msra.mxu3 %v683_v31  ;;  %413 = vmatpush.msra.mxu2 %v665_v33  ;;  %v678_v51 = vld [vmem:[%s1281_s10 + $0x198] sm:$0xff]  ;;  %v309_v54 = vld [vmem:[%s1281_s10 + $0x10] sm:$0xff]  ;;  %v659_v57 = vld [vmem:[%s1281_s10 + $0x108] sm:$0xff] }
  0x64   : > { %371 = vmatpush.msra.mxu1 %v649_v32  ;;  %331 = vmatpush.msra.mxu0 %v314_v34  ;;  %v644_v52 = vld [vmem:[%s1281_s10 + $0x98] sm:$0xff]  ;;  %v677_v55 = vld [vmem:[%s1281_s10 + $0x190] sm:$0xff]  ;;  %v308_v58 = vld [vmem:[%s1281_s10 + $0x8] sm:$0xff] }
  0x65   : > { %454 = vmatpush.msra.mxu3 %v682_v35  ;;  %414 = vmatpush.msra.mxu2 %v664_v37  ;;  %v643_v56 = vld [vmem:[%s1281_s10 + $0x90] sm:$0xff]  ;;  %v676_v59 = vld [vmem:[%s1281_s10 + $0x188] sm:$0xff]  ;;  %v658_v61 = vld [vmem:[%s1281_s10 + $0x100] sm:$0xff] }
  0x66   : > { %372 = vmatpush.msra.mxu1 %v648_v36  ;;  %332 = vmatpush.msra.mxu0 %v313_v38  ;;  %v642_v60 = vld [vmem:[%s1281_s10 + $0x88] sm:$0xff]  ;;  %v307_v62 = vld [vmem:[%s1281_s10] sm:$0xff] }
  0x67   : > { %455 = vmatpush.msra.mxu3 %v681_v39  ;;  %415 = vmatpush.msra.mxu2 %v663_v41  ;;  %v304_v63 = vld [vmem:[%s303_s27] sm:$0xff] }
  0x68   : > { %373 = vmatpush.msra.mxu1 %v647_v40  ;;  %333 = vmatpush.msra.mxu0 %v312_v42  ;;  %v675_v0 = vld [vmem:[%s1281_s10 + $0x180] sm:$0xff] }
  0x69   : > { %456 = vmatpush.msra.mxu3 %v680_v43  ;;  %416 = vmatpush.msra.mxu2 %v662_v45  ;;  %v641_v1 = vld [vmem:[%s1281_s10 + $0x80] sm:$0xff] }
  0x6a   : > { %374 = vmatpush.msra.mxu1 %v646_v44  ;;  %334 = vmatpush.msra.mxu0 %v311_v46  ;;  %v305_v3 = vld [vmem:[%s1296_s28] sm:$0xff] }
  0x6b   : > { %457 = vmatpush.msra.mxu3 %v679_v47  ;;  %417 = vmatpush.msra.mxu2 %v661_v49 }
  0x6c   : > { %375 = vmatpush.msra.mxu1 %v645_v48  ;;  %335 = vmatpush.msra.mxu0 %v310_v50 }
  0x6d   : > { %458 = vmatpush.msra.mxu3 %v678_v51  ;;  %418 = vmatpush.msra.mxu2 %v660_v53 }
  0x6e   : > { %376 = vmatpush.msra.mxu1 %v644_v52  ;;  %336 = vmatpush.msra.mxu0 %v309_v54 }
  0x6f   : > { %459 = vmatpush.msra.mxu3 %v677_v55  ;;  %419 = vmatpush.msra.mxu2 %v659_v57 }
  0x70   : > { %377 = vmatpush.msra.mxu1 %v643_v56  ;;  %337 = vmatpush.msra.mxu0 %v308_v58 }
  0x71   : > { %460 = vmatpush.msra.mxu3 %v676_v59  ;;  %420 = vmatpush.msra.mxu2 %v658_v61 }
  0x72   : > { %378 = vmatpush.msra.mxu1 %v642_v60  ;;  %338 = vmatpush.msra.mxu0 %v307_v62 }
  0x73   : > { %421 = vmatmul.f32.vlgmr.msra.gmra.mxu2 %v304_v63  ;;  %461 = vmatpush.msra.mxu3 %v675_v0 }
  0x74   : > { %339 = vmatmul.f32.vlgmr.msra.gmra.mxu0 %v304_v63  ;;  %462 = vmatmul.f32.vlgmr.msra.gmra.mxu3 %v304_v63 }
  0x75   : > { %379 = vmatpush.msra.mxu1 %v641_v1 }
  0x76   : > { %380 = vmatmul.f32.vlgmr.msra.gmra.mxu1 %v304_v63 }
  0xf1   : > { %v340_v4 = vpop.f32.mrf.mxu0 }
  0xf2   : > { %v344_v6 = vmul.f32 %v343_v2, %v340_v4 }
  0xf3   : > { %v381_v7 = vpop.f32.mrf.mxu1 }
  0xf4   : > { %v345_v8 = vadd.f32 %v344_v6, %v305_v3  ;;  %v385_v9 = vmul.f32 %v384_v5, %v381_v7 }
  0xf6   : > { %v386_v12 = vadd.f32 %v385_v9, %v345_v8  ;;  %v422_v13 = vpop.f32.mrf.mxu2 }
  0xf7   : > { %v426_v14 = vmul.f32 %v425_v10, %v422_v13  ;;  %v463_v15 = vpop.f32.mrf.mxu3 }
  0xf8   : > { %v467_v16 = vmul.f32 %v466_v11, %v463_v15 }
  0xf9   : > { %v427_v17 = vadd.f32 %v426_v14, %v386_v12  ;;  %473 = sbr.rel (%p691_p5) target bundleno = 264 (0x108), region = 60 }
  0xfb   : > { %v468_v18 = vadd.f32 %v467_v16, %v427_v17 }
  0xfd   : > { %469 = vst [vmem:[%s1296_s28] sm:$0xff] %v468_v18 }
  0xfe   : > { %v827_v20 = vld [vmem:[%s266_s14] ss:$0 sm:$0xff] }
 0x104   : > { %v475_v19 = vld [vmem:[%s1296_s28] sm:$0xff] }
 0x105   : > { %v479_v21 = vadd.f32 %v827_v20, %v475_v19 }
 0x107   : > { %480 = vst [vmem:[%s1296_s28] sm:$0xff] %v479_v21 }
 0x108 PF: > { %s693_s5 = sshll.u32 %s1055_s22, 3  ;;  %s1454_s23 = sld [smem:[#allocation22_spill]] }
 0x109   : > { %s494_s21 = sshll.u32 %s1296_s28, 4  ;;  %s482_s12 = scalar_lea.sflag [#allocation4], %s1288_s13  ;;  %s495_s21 = int_to_ptr.vmem [resolvable:$true] %s494_s21 }
 0x10e   : > { %s1455_s6 = smov %s1454_s23  ;;  %s492_s8 = scalar_lea.hbm %s1454_s23, %s693_s5 }
 0x10f   : > { %s496_s10 = sshll.u32 %s492_s8, 4  ;;  %s953_s22 = scalar_lea.hbm %s1455_s6, 16  ;;  %s497_s10 = int_to_ptr.hbm [resolvable:$true] %s496_s10 }
 0x110   : > { %s947_s26 = sshra.s32 %s497_s10, 4  ;;  %s948_s26 = int_to_ptr.hbm [resolvable:$true] %s947_s26 }
 0x111   : > { %s949_s14 = scalar_lea.hbm %s948_s26, 8  ;;  %p954_p0 = scmp.lt.s32.totalorder %s948_s26, %s1455_s6 }
 0x112   : > { %p950_p6 = scmp.ne.s32.totalorder %s948_s26, %s949_s14  ;;  %p955_p1 = scmp.lt.s32.totalorder %s953_s22, %s949_s14 }
 0x114   : > { %p951_p10 = pnand %p950_p6, %p1262_p7  ;;  %p956_p8 = por %p955_p1, %p954_p0 }
 0x116   : > { %p952_p12 = pneg %p951_p10 }
 0x118   : > { %p957_p11 = pnand %p956_p8, %p952_p12 }
 0x11a   : > { %960 = shalt.err (!%p957_p11)
}
 0x11b   : > { %708 = dma.vmem_to_hbm [thread:$0]  (%p1262_p7), %s495_s21, 128, %s497_s10, %s482_s12  }
 0x11c PF: > { %p733_p13 = scmp.ge.s32.totalorder %s1067_s25, 2  ;;  %s508_s13 = sand.u32 1, %s1027_s15  }
 0x11d   : > { %s509_s28 = scalar_lea.sflag [#allocation4], %s508_s13 }
 0x11e   : > { %p725_p4 = pnand %p733_p13, %p1222_p3 }
 0x120   : > { %p726_p9 = pneg %p725_p4 }
 0x122   : > { %1022 = dma.done.wait (%p726_p9), %s509_s28, 128  }
 0x123   : > { %1024 = vsyncadd (%p726_p9), %s509_s28, 4294967168  ;;  %s22_s25 = sadd.s32 1, %s1067_s25   ;;  %s1456_s21 = sld [smem:[#allocation16_spill]] }
 0x124   : > { %p19_p2 = scmp.ge.s32.totalorder %s22_s25, 10   ;;  %s1457_s23 = sld [smem:[#allocation17_spill]] }
 0x125   : > { %s1458_s9 = sld [smem:[#allocation18_spill]]  ;;  %s1459_s15 = smov %s1031_s16 }
 0x126   : > { %s1460_s16 = smov %s1035_s17  ;;  %s1461_s17 = smov %s1253_s1 }
 0x127   : > { %s1462_s18 = smov %s1043_s19  ;;  %s1463_s19 = smov %s1047_s20 }
 0x128   : > { %s1464_s20 = smov %s1184_s11  ;;  %s1465_s22 = smov %s1063_s24 }
 0x129   :  { %21 = sbr.rel (!%p19_p2) target bundleno = 16 (0x10), region = 114 }
 0x12b   : > { %s1466_s24 = smov %s1458_s9 }
 0x12e   :  { %515 = vsyncpa [#allocation3], 1 }
 0x12f   :  { %517 = vsyncpa [#allocation3 + $0x1], 1 }
 0x130   :  { %518 = vsyncpa [#allocation8], 1 }
 0x131   :  { %520 = vsyncpa [#allocation8 + $0x1], 1 }
 0x132   :  { %521 = vsyncpa [#allocation4], 1 }
 0x133   :  { %523 = vsyncpa [#allocation4 + $0x1], 1 }
 0x134   :  { %524 = vsyncpa [#allocation5], 1 }
 0x135   :  { %526 = vsyncpa [#allocation5 + $0x1], 1 }

</bundles_post_ra>
